<compile_context>
chip_gen: v5e
topology: v5e:2x2
jax: 0.10.0
libtpu: 0.0.40
codegen_flags: <defaults>
</compile_context>

<pallas_src>
import math
import functools

import jax
import jax.numpy as jnp
from jax.experimental import pallas as pl
from jax.experimental.pallas import tpu as pltpu


def _round_up(v, m):
    return ((v + m - 1) // m) * m


def _compiler_params(semantics, est_bytes):
    # Explicit scoped-VMEM limit: 2x headroom over the double-buffered tile
    # estimate, floored at 16 MiB and capped below v7x's 64 MiB physical VMEM.
    vmem = int(min(max(2 * est_bytes, 16 * 1024 * 1024), 56 * 1024 * 1024))
    return pltpu.CompilerParams(dimension_semantics=semantics,
                                vmem_limit_bytes=vmem)


# --------------------------------------------------------------------------
# Kernel 1: fused similarity  sim_all = x_flat @ memory.T   (R, M)
# --------------------------------------------------------------------------
def _sim_kernel(x_ref, mem_ref, out_ref):
    # x_ref: (TM, D)   mem_ref: (TN, D)   out_ref: (TM, TN)
    out_ref[...] = jax.lax.dot_general(
        x_ref[...], mem_ref[...], (((1,), (1,)), ((), ())),
        preferred_element_type=jnp.float32)


def similarity_matmul(x_flat, memory, compute_dtype=jnp.bfloat16):
    """x_flat @ memory.T with bf16 operands (default) and f32 accumulation."""
    R, D = x_flat.shape
    M, _ = memory.shape
    xc = x_flat.astype(compute_dtype)
    mc = memory.astype(compute_dtype)

    # Row tile: rows are few (B * slots); one full tile when small, otherwise
    # 128/256-row tiles (pad the handful of rows if misaligned).
    if R <= 512:
        TM, Rp = R, R
    else:
        TM = 256 if R % 256 == 0 else 128
        Rp = _round_up(R, TM)
        if Rp != R:
            xc = jnp.pad(xc, ((0, Rp - R), (0, 0)))

    # Memory tile: wide, lane-dense output tiles (256+ keeps the v6e/v7x
    # 256x256 MXU fed; 128 already saturates v5e).  Pad instead of the old
    # full-array fallback (which would VMEM-OOM on v7x for large banks).
    TN, Mp = None, M
    for cand in (512, 256, 128):
        if M % cand == 0:
            TN = cand
            break
    if TN is None:
        TN = 128
        Mp = _round_up(M, TN)
        mc = jnp.pad(mc, ((0, Mp - M), (0, 0)))

    # TODO(synk): tile the contraction axis D as well for very large feature
    # sizes; kept full here (D is the last/lane axis and typically modest).
    esz = jnp.dtype(compute_dtype).itemsize
    est = 2 * (TM * D * esz + TN * D * esz + TM * TN * 4)

    # Grid: memory-tile axis OUTER, row-tile axis INNER -> the (TN, D) memory
    # block index is constant across consecutive steps, so memory is DMA'd
    # from HBM exactly once; only the tiny x tile is re-read per memory tile.
    grid = (Mp // TN, Rp // TM)
    out = pl.pallas_call(
        _sim_kernel,
        out_shape=jax.ShapeDtypeStruct((Rp, Mp), jnp.float32),
        grid_spec=pltpu.PrefetchScalarGridSpec(
            num_scalar_prefetch=0,
            grid=grid,
            in_specs=[
                pl.BlockSpec((TM, D), lambda j, i: (i, 0)),
                pl.BlockSpec((TN, D), lambda j, i: (j, 0)),
            ],
            out_specs=pl.BlockSpec((TM, TN), lambda j, i: (i, j)),
        ),
        compiler_params=_compiler_params(("parallel", "parallel"), est),
    )(xc, mc)
    if Rp != R or Mp != M:
        out = out[:R, :M]
    return out


# --------------------------------------------------------------------------
# Kernel 2: get = mean_b( onehot(y)^T @ (x_pos * visible) ), fused with
#           pos_new = memory[:n_pos]*momentum + get*(1-momentum)
# Grid: (D tiles [parallel], batch tiles [arbitrary reduction]).
# --------------------------------------------------------------------------
def _get_kernel(y_ref, vis_ref, x_ref, mempos_ref, out_ref, acc_ref,
                *, n_pos, batch, nb, momentum):
    b = pl.program_id(1)

    @pl.when(b == 0)
    def _():
        acc_ref[...] = jnp.zeros_like(acc_ref)

    y = y_ref[...]            # (1, rows) int32     rows = TB * n_pos
    vis = vis_ref[...]        # (1, rows) f32
    x = x_ref[...]            # (rows, TD) f32
    rows = x.shape[0]

    # masked one-hot^T: onehot_t[c, j] = (y[j] == c) * vis[j]
    classes = jax.lax.broadcasted_iota(jnp.int32, (n_pos, rows), 0)
    masked_onehot_t = (classes == y).astype(jnp.float32) * vis

    acc_ref[...] += jnp.dot(masked_onehot_t, x,
                            preferred_element_type=jnp.float32)

    @pl.when(b == nb - 1)
    def _():
        get_mean = acc_ref[...] * (1.0 / batch)
        out_ref[...] = mempos_ref[...] * momentum + get_mean * (1.0 - momentum)


def _pick_batch_tile(batch, n_pos, td):
    # Largest divisor of `batch` whose x tile stays modest and whose flattened
    # row count satisfies BlockSpec alignment (full batch, or rows % 128 == 0).
    limit = 2 * 1024 * 1024
    aligned = [tb for tb in range(1, batch + 1)
               if batch % tb == 0 and (tb == batch or (tb * n_pos) % 128 == 0)]
    fitting = [tb for tb in aligned if tb * n_pos * td * 4 <= limit]
    return max(fitting) if fitting else min(aligned)


def get_and_blend(y_flat, vis_flat, x_pos_flat, mem_pos, momentum, batch, n_pos):
    rows_total, D = x_pos_flat.shape          # rows_total == batch * n_pos
    TD = 256 if D % 256 == 0 else (128 if D % 128 == 0 else D)
    TB = _pick_batch_tile(batch, n_pos, TD)
    nb = batch // TB
    nd = D // TD
    rows = TB * n_pos

    est = 2 * (rows * TD * 4 + 2 * rows * 4 + 2 * n_pos * TD * 4) + n_pos * TD * 4
    kern = functools.partial(_get_kernel, n_pos=n_pos, batch=batch, nb=nb,
                             momentum=float(momentum))
    return pl.pallas_call(
        kern,
        out_shape=jax.ShapeDtypeStruct((n_pos, D), jnp.float32),
        grid_spec=pltpu.PrefetchScalarGridSpec(
            num_scalar_prefetch=0,
            grid=(nd, nb),                    # D parallel (megacore), batch = reduction
            in_specs=[
                pl.BlockSpec((1, rows), lambda d, b: (0, b)),     # y (flattened)
                pl.BlockSpec((1, rows), lambda d, b: (0, b)),     # visible (flattened)
                pl.BlockSpec((rows, TD), lambda d, b: (b, d)),    # x_pos (flattened)
                pl.BlockSpec((n_pos, TD), lambda d, b: (0, d)),   # memory[:n_pos]
            ],
            out_specs=pl.BlockSpec((n_pos, TD), lambda d, b: (0, d)),
            scratch_shapes=[pltpu.VMEM((n_pos, TD), jnp.float32)],
        ),
        compiler_params=_compiler_params(("parallel", "arbitrary"), est),
    )(y_flat, vis_flat, x_pos_flat, mem_pos)


# --------------------------------------------------------------------------
# Kernel 3: row-wise L2 normalization (F.normalize, p=2, dim=1, eps=1e-12)
# --------------------------------------------------------------------------
def _l2norm_kernel(m_ref, o_ref):
    m = m_ref[...]
    ss = jnp.sum(m * m, axis=1, keepdims=True)
    # max(sqrt(ss), eps) == sqrt(max(ss, eps^2)); rsqrt runs on the EUP slot.
    o_ref[...] = m * jax.lax.rsqrt(jnp.maximum(ss, 1e-24))


def l2_normalize_rows(mat):
    R, D = mat.shape
    TR, Rp, padded = None, R, False
    for cand in (2048, 1024, 512, 256, 128):
        if R % cand == 0:
            TR = cand
            break
    if TR is None:
        if R <= 1024:
            TR = R                            # small: one full-row block
        else:
            TR = 256                          # large & misaligned: pad, never
            Rp = _round_up(R, TR)             # one giant full-array block
            padded = True
            mat = jnp.pad(mat, ((0, Rp - R), (0, 0)))
    est = 4 * TR * D * 4
    out = pl.pallas_call(
        _l2norm_kernel,
        out_shape=jax.ShapeDtypeStruct((Rp, D), jnp.float32),
        grid_spec=pltpu.PrefetchScalarGridSpec(
            num_scalar_prefetch=0,
            grid=(Rp // TR,),
            in_specs=[pl.BlockSpec((TR, D), lambda i: (i, 0))],
            out_specs=pl.BlockSpec((TR, D), lambda i: (i, 0)),
        ),
        compiler_params=_compiler_params(("parallel",), est),
    )(mat)
    return out[:R] if padded else out


# --------------------------------------------------------------------------
# Module wrapper (state kept host-side, mirroring the PyTorch buffers)
# --------------------------------------------------------------------------
class NearestMemoryManagerPallas:
    def __init__(self, input_size, output_size, K, num_pos, T=0.07,
                 momentum=0.5, Z=None, max_groups=-1, num_noise=-1, seed=0):
        self.nLem = output_size
        self.K = K
        self.T = T
        self.momentum = momentum
        self.group_size = K                   # params[0]
        stdv = 1.0 / math.sqrt(input_size / 3)
        key = jax.random.PRNGKey(seed)
        # deterministic init, same distribution as torch.rand(...)*2*stdv - stdv
        self.memory = (jax.random.uniform(key, (output_size, input_size),
                                          dtype=jnp.float32) * (2 * stdv) - stdv)
        self.lru = 0
        self.max_lru = max_groups if max_groups > 0 else -1
        self.num_noise = K if num_noise < 0 else num_noise
        self.num_pos = num_pos
        self.accumulate_num = jnp.zeros((num_pos,), dtype=jnp.int32)

    def forward(self, x, y, visible):
        n_pos = self.num_pos
        n_neg = self.num_noise
        B, S, D = x.shape
        M = self.memory.shape[0]
        if self.max_lru == -1 and n_neg > 0 and B <= (self.nLem - n_pos) / n_neg:
            self.max_lru = (M - n_pos) // (n_neg * B)
        assert self.group_size == 1, "Currently only support group size = 1"
        momentum = self.momentum

        # ---- fused similarity: one flattened matmul, sliced afterwards ----
        sim_all = similarity_matmul(x.reshape(B * S, D), self.memory)
        sim_all = sim_all.reshape(B, S, M)
        if n_neg == 0:
            similarity = sim_all                                   # x (full) @ memory.T
            noise_similarity = jnp.zeros((1,), dtype=jnp.float32)  # torch.zeros(1)
        else:
            similarity = sim_all[:, :n_pos, :]
            noise_similarity = sim_all[:, n_pos:, :n_pos]          # x_neg @ memory[:n_pos].T

        y_idx = y.astype(jnp.int32)            # group_size == 1

        # ---- batched get/blend (kept f32: feeds the memory update) ----
        x_pos = x[:, :n_pos, :]
        vis_f = visible.astype(jnp.float32)
        pos_new = get_and_blend(
            y.astype(jnp.int32).reshape(1, B * n_pos),
            vis_f.reshape(1, B * n_pos),
            x_pos.reshape(B * n_pos, D).astype(jnp.float32),
            self.memory[:n_pos],
            momentum, B, n_pos)

        # ---- LRU negative-slot update (XLA glue) + Pallas L2 normalization ----
        if n_neg > 0:
            x_neg = x[:, n_pos:, :]
            if B > (self.nLem - n_pos) / n_neg:
                neg_parts = x_neg.reshape(-1, D)[0:M - n_pos]
            else:
                start = self.lru * n_neg * B
                neg_parts = jnp.concatenate(
                    [self.memory[n_pos:n_pos + start, :],
                     x_neg.reshape(-1, D),
                     self.memory[n_pos + start + n_neg * B:, :]], axis=0)
            new_mem_unnorm = jnp.concatenate([pos_new, neg_parts], axis=0)
        else:
            new_mem_unnorm = pos_new
        self.memory = l2_normalize_rows(new_mem_unnorm)

        # tiny bookkeeping reduction stays in plain JAX
        self.accumulate_num = self.accumulate_num + jnp.sum(
            (visible > 0).astype(jnp.int32), axis=0)
        self.lru += 1
        self.lru = self.lru % self.max_lru     # mirrors the PyTorch module
        return similarity, y_idx, noise_similarity


# --------------------------------------------------------------------------
# Pure-JAX reference for sanity checks
# --------------------------------------------------------------------------
def _reference_forward(x, y, visible, memory, n_pos, n_neg, lru, momentum,
                       compute_dtype=jnp.float32):
    B, S, D = x.shape
    x_pos = x[:, :n_pos, :]
    x_neg = x[:, n_pos:, :]
    sim_all = jnp.einsum("bsd,md->bsm", x.astype(compute_dtype),
                         memory.astype(compute_dtype),
                         preferred_element_type=jnp.float32)
    sim = sim_all[:, :n_pos, :]
    noise = sim_all[:, n_pos:, :n_pos]
    onehot = jax.nn.one_hot(y, n_pos, dtype=jnp.float32)          # (B, n_pos, n_pos)
    get = jnp.einsum("bic,bid->cd", onehot,
                     x_pos * visible.astype(jnp.float32)[..., None]) / B
    pos_new = memory[:n_pos] * momentum + get * (1.0 - momentum)
    start = lru * n_neg * B
    neg_parts = jnp.concatenate(
        [memory[n_pos:n_pos + start], x_neg.reshape(-1, D),
         memory[n_pos + start + n_neg * B:]], axis=0)
    new_mem = jnp.concatenate([pos_new, neg_parts], axis=0)
    new_mem = new_mem / jnp.maximum(
        jnp.linalg.norm(new_mem, axis=1, keepdims=True), 1e-12)
    return sim, noise, new_mem


if __name__ == "__main__":
    # Small, (8,128)-friendly shapes: D=128 features, M=256 memory slots,
    # n_pos = n_neg = 8, batch = 2.
    B, n_pos, n_neg, D, M = 2, 8, 8, 128, 256

    mgr = NearestMemoryManagerPallas(input_size=D, output_size=M, K=1,
                                     num_pos=n_pos, momentum=0.5,
                                     num_noise=n_neg, seed=0)

    key = jax.random.PRNGKey(0)
    kx, ky, kv = jax.random.split(key, 3)
    x = jax.random.normal(kx, (B, n_pos + n_neg, D), dtype=jnp.float32)
    y = jax.random.randint(ky, (B, n_pos), 0, n_pos, dtype=jnp.int32)
    visible = (jax.random.uniform(kv, (B, n_pos)) > 0.3).astype(jnp.float32)

    mem_before = mgr.memory
    lru_before = mgr.lru
    sim, y_idx, noise_sim = mgr.forward(x, y, visible)
    jax.block_until_ready((sim, y_idx, noise_sim, mgr.memory, mgr.accumulate_num))

    # tight check vs a bf16-operand / f32-accumulation reference, loose vs f32
    ref_sim_bf, ref_noise_bf, _ = _reference_forward(
        x, y, visible, mem_before, n_pos, n_neg, lru_before, mgr.momentum,
        compute_dtype=jnp.bfloat16)
    ref_sim_f32, ref_noise_f32, ref_mem = _reference_forward(
        x, y, visible, mem_before, n_pos, n_neg, lru_before, mgr.momentum,
        compute_dtype=jnp.float32)

    assert sim.shape == (B, n_pos, M)
    assert noise_sim.shape == (B, n_neg, n_pos)
    assert y_idx.shape == (B, n_pos)
    assert jnp.allclose(sim, ref_sim_bf, atol=1e-2, rtol=1e-2)
    assert jnp.allclose(noise_sim, ref_noise_bf, atol=1e-2, rtol=1e-2)
    assert jnp.allclose(sim, ref_sim_f32, atol=8e-2, rtol=8e-2)
    assert jnp.allclose(noise_sim, ref_noise_f32, atol=8e-2, rtol=8e-2)
    # memory-update path stays f32 -> tight match; rows must be unit-norm
    assert jnp.allclose(mgr.memory, ref_mem, atol=1e-3, rtol=1e-3)
    assert jnp.allclose(jnp.linalg.norm(mgr.memory, axis=1),
                        jnp.ones((M,)), atol=1e-3)
    assert jnp.array_equal(y_idx, y)
    assert jnp.array_equal(mgr.accumulate_num,
                           jnp.sum((visible > 0).astype(jnp.int32), axis=0))

    print("KERNEL_OK")
</pallas_src>

<mosaic_0001>
module attributes {stable_mosaic.version = 11 : i64} {
  func.func @_sim_kernel(%arg0: i32, %arg1: i32, %arg2: memref<32x128xbf16, #tpu.memory_space<vmem>>, %arg3: memref<256x128xbf16, #tpu.memory_space<vmem>>, %arg4: memref<32x256xf32, #tpu.memory_space<vmem>>) attributes {dimension_semantics = [#tpu.dimension_semantics<parallel>, #tpu.dimension_semantics<parallel>], iteration_bounds = array<i64: 1, 1>, scalar_prefetch = 0 : i64, scratch_operands = 0 : i64, tpu.core_type = #tpu.core_type<tc>, window_params = [{transform_indices = @transform_0, window_bounds = array<i64: 32, 128>}, {transform_indices = @transform_1, window_bounds = array<i64: 256, 128>}, {transform_indices = @transform_2, window_bounds = array<i64: 32, 256>}]} {
    %c0 = arith.constant 0 : index
    %c0_0 = arith.constant 0 : index
    %0 = vector.load %arg2[%c0, %c0_0] : memref<32x128xbf16, #tpu.memory_space<vmem>>, vector<32x128xbf16>
    %c0_1 = arith.constant 0 : index
    %c0_2 = arith.constant 0 : index
    %1 = vector.load %arg3[%c0_1, %c0_2] : memref<256x128xbf16, #tpu.memory_space<vmem>>, vector<256x128xbf16>
    %cst = arith.constant dense<0.000000e+00> : vector<32x256xf32>
    %2 = tpu.matmul %0, %1, %cst {dimension_numbers = #tpu.dot_dimension_numbers<[1], [1], [0], [0], [0, 0, 1, 0], [], []>} : vector<32x128xbf16>, vector<256x128xbf16>, vector<32x256xf32> -> vector<32x256xf32>
    %c0_3 = arith.constant 0 : index
    %c0_4 = arith.constant 0 : index
    %3 = vector.load %arg4[%c0_3, %c0_4] : memref<32x256xf32, #tpu.memory_space<vmem>>, vector<32x256xf32>
    tpu.vector_store %arg4[%c0_3, %c0_4], %2 {strides = array<i32>} : memref<32x256xf32, #tpu.memory_space<vmem>>, vector<32x256xf32>,
    return
  }
  func.func @transform_0(%arg0: i32, %arg1: i32) -> (i32, i32) {
    %c0_i32 = arith.constant 0 : i32
    %c0_i32_0 = arith.constant 0 : i32
    return %arg1, %c0_i32 : i32, i32
  }
  func.func @transform_1(%arg0: i32, %arg1: i32) -> (i32, i32) {
    %c0_i32 = arith.constant 0 : i32
    %c0_i32_0 = arith.constant 0 : i32
    return %arg0, %c0_i32 : i32, i32
  }
  func.func @transform_2(%arg0: i32, %arg1: i32) -> (i32, i32) {
    %c0_i32 = arith.constant 0 : i32
    return %arg1, %arg0 : i32, i32
  }
}

</mosaic_0001>

<bundles_post_ra>
// kernel: tpu_custom_call.1
= control target key start
LH: loop header
LB: loop body
LE: loop exit
PB: predicated region body
PF: predicated region fallthrough
CT: control target
= control target key end

     0   :  { %7 = vsyncpa [#allocation3], 0  ;;  %s476_s0 = inlined_call_operand.hbm [shape: bf16[32,128], index: 0, kind: input, shape index: {}]   ;;  %s477_s1 = inlined_call_operand.hbm [shape: bf16[256,128], index: 1, kind: input, shape index: {}]   ;;  %s478_s2 = inlined_call_operand.hbm [shape: f32[32,256], index: 2, kind: output, shape index: {}]  }
   0x1   :  { %8 = vsyncpa [#allocation6], 0 }
   0x2   :  { %9 = vsyncpa [#allocation4], 0  ;;  %s14_s11 = sshll.u32 %s476_s0, 4  ;;  %s445_s12 = smov [#allocation2]   ;;  %s15_s11 = int_to_ptr.hbm [resolvable:$true] %s14_s11 }
   0x3   :  { %s16_s13 = sshll.u32 %s445_s12, 4  ;;  %s27_s16 = sshll.u32 %s477_s1, 4  ;;  %s17_s13 = int_to_ptr.vmem [resolvable:$true] %s16_s13  ;;  %s28_s16 = int_to_ptr.hbm [resolvable:$true] %s27_s16 }
   0x4   :  { %s446_s17 = smov 64   ;;  %s447_s18 = smov 4  }
   0x5   :  { %22 = dma.hbm_to_vmem [thread:$0]  %s15_s11, 256, %s17_s13, [#allocation3], %s446_s17, %s446_s17, %s447_s18  }
   0x6   :  { %s448_s19 = smov [#allocation5]  }
   0x7   :  { %s29_s20 = sshll.u32 %s448_s19, 4  ;;  %s30_s20 = int_to_ptr.vmem [resolvable:$true] %s29_s20 }
   0x8   :  { %35 = dma.hbm_to_vmem [thread:$0]  %s28_s16, 2048, %s30_s20, [#allocation6], %s446_s17, %s446_s17, %s447_s18  }
   0x9   :  { %439 = dma.done.wait [#allocation3], 256  }
   0xa   :  { %440 = vsyncadd [#allocation3], 4294967040 }
   0xb   :  { %441 = dma.done.wait [#allocation6], 2048  }
   0xc   :  { %442 = vsyncadd [#allocation6], 4294965248  ;;  %v335_v0 = vld [vmem:[#allocation5 + $0x38] sm:$0xff]  ;;  %v334_v2 = vld [vmem:[#allocation5 + $0x30] sm:$0xff]  ;;  %s449_s0 = smov [#allocation7]   ;;  %s240_s23 = sshll.u32 %s478_s2, 4  ;;  %s241_s23 = int_to_ptr.hbm [resolvable:$true] %s240_s23 }
   0xd   :  { %v343_v1 = vld [vmem:[#allocation5 + $0x78] sm:$0xff]  ;;  %188 = vmatpush.bf16.xpose.msra.mxu0 %v335_v0  ;;  %344 = vmatpush.bf16.xpose.msra.mxu2 %v335_v0  ;;  %v342_v3 = vld [vmem:[#allocation5 + $0x70] sm:$0xff]  ;;  %v333_v4 = vld [vmem:[#allocation5 + $0x28] sm:$0xff]  ;;  %s238_s1 = sshll.u32 %s449_s0, 4  ;;  %s450_s24 = smov 256   ;;  %s239_s1 = int_to_ptr.vmem [resolvable:$true] %s238_s1 }
   0xe   :  { %207 = vmatpush.bf16.xpose.msra.mxu1 %v343_v1  ;;  %352 = vmatpush.bf16.xpose.msra.mxu3 %v343_v1  ;;  %v341_v5 = vld [vmem:[#allocation5 + $0x68] sm:$0xff]  ;;  %v332_v6 = vld [vmem:[#allocation5 + $0x20] sm:$0xff]  ;;  %v331_v8 = vld [vmem:[#allocation5 + $0x18] sm:$0xff]  ;;  %s451_s25 = smov 16  }
   0xf   :  { %v340_v7 = vld [vmem:[#allocation5 + $0x60] sm:$0xff]  ;;  %v339_v9 = vld [vmem:[#allocation5 + $0x58] sm:$0xff]  ;;  %v330_v10 = vld [vmem:[#allocation5 + $0x10] sm:$0xff] }
  0x10   :  { %v338_v11 = vld [vmem:[#allocation5 + $0x50] sm:$0xff]  ;;  %v329_v12 = vld [vmem:[#allocation5 + $0x8] sm:$0xff]  ;;  %v328_v14 = vld [vmem:[#allocation5] sm:$0xff] }
  0x11   :  { %v337_v13 = vld [vmem:[#allocation5 + $0x48] sm:$0xff]  ;;  %v336_v15 = vld [vmem:[#allocation5 + $0x40] sm:$0xff]  ;;  %v326_v16 = vld [vmem:[#allocation2] sm:$0xff] }
  0x12   :  { %v327_v17 = vld [vmem:[#allocation2 + $0x8] sm:$0xff] }
  0x15   :  { %189 = vmatpush.bf16.xpose.msra.mxu0 %v334_v2  ;;  %345 = vmatpush.bf16.xpose.msra.mxu2 %v334_v2 }
  0x16   :  { %208 = vmatpush.bf16.xpose.msra.mxu1 %v342_v3  ;;  %353 = vmatpush.bf16.xpose.msra.mxu3 %v342_v3 }
  0x1d   :  { %190 = vmatpush.bf16.xpose.msra.mxu0 %v333_v4  ;;  %346 = vmatpush.bf16.xpose.msra.mxu2 %v333_v4 }
  0x1e   :  { %209 = vmatpush.bf16.xpose.msra.mxu1 %v341_v5  ;;  %354 = vmatpush.bf16.xpose.msra.mxu3 %v341_v5 }
  0x25   :  { %191 = vmatpush.bf16.xpose.msra.mxu0 %v332_v6  ;;  %347 = vmatpush.bf16.xpose.msra.mxu2 %v332_v6 }
  0x26   :  { %210 = vmatpush.bf16.xpose.msra.mxu1 %v340_v7  ;;  %355 = vmatpush.bf16.xpose.msra.mxu3 %v340_v7 }
  0x2d   :  { %192 = vmatpush.bf16.xpose.msra.mxu0 %v331_v8  ;;  %348 = vmatpush.bf16.xpose.msra.mxu2 %v331_v8 }
  0x2e   :  { %211 = vmatpush.bf16.xpose.msra.mxu1 %v339_v9  ;;  %356 = vmatpush.bf16.xpose.msra.mxu3 %v339_v9 }
  0x35   :  { %193 = vmatpush.bf16.xpose.msra.mxu0 %v330_v10  ;;  %349 = vmatpush.bf16.xpose.msra.mxu2 %v330_v10 }
  0x36   :  { %212 = vmatpush.bf16.xpose.msra.mxu1 %v338_v11  ;;  %357 = vmatpush.bf16.xpose.msra.mxu3 %v338_v11 }
  0x3d   :  { %194 = vmatpush.bf16.xpose.msra.mxu0 %v329_v12  ;;  %350 = vmatpush.bf16.xpose.msra.mxu2 %v329_v12 }
  0x3e   :  { %213 = vmatpush.bf16.xpose.msra.mxu1 %v337_v13  ;;  %358 = vmatpush.bf16.xpose.msra.mxu3 %v337_v13 }
  0x45   :  { %195 = vmatpush.bf16.xpose.msra.mxu0 %v328_v14  ;;  %351 = vmatpush.bf16.xpose.msra.mxu2 %v328_v14 }
  0x46   :  { %214 = vmatpush.bf16.xpose.msra.mxu1 %v336_v15  ;;  %359 = vmatpush.bf16.xpose.msra.mxu3 %v336_v15 }
  0x4c   :  { %196 = vmatmul.bf16.vlgmr.msra.gmra.mxu0 %v326_v16  ;;  %201 = vmatmul.bf16.vlgmr.msra.gmra.mxu2 %v327_v17 }
  0x4d   :  { %215 = vmatmul.bf16.vlgmr.msra.gmra.mxu1 %v326_v16  ;;  %220 = vmatmul.bf16.vlgmr.msra.gmra.mxu3 %v327_v17 }
  0xc9   :  { %v197_v18 = vpop.f32.mrf.mxu0 }
  0xca   :  { %226 = vst [vmem:[#allocation7] sm:$0xff] %v197_v18  ;;  %v216_v19 = vpop.f32.mrf.mxu1 }
  0xcb   :  { %227 = vst [vmem:[#allocation7 + $0x8] sm:$0xff] %v216_v19 }
  0xcf   :  { %v202_v20 = vpop.f32.mrf.mxu2 }
  0xd0   :  { %230 = vst [vmem:[#allocation7 + $0x20] sm:$0xff] %v202_v20  ;;  %v221_v21 = vpop.f32.mrf.mxu3 }
  0xd1   :  { %231 = vst [vmem:[#allocation7 + $0x28] sm:$0xff] %v221_v21  ;;  %v199_v22 = vpop.f32.mrf.mxu0 }
  0xd2   :  { %228 = vst [vmem:[#allocation7 + $0x10] sm:$0xff] %v199_v22  ;;  %v218_v23 = vpop.f32.mrf.mxu1 }
  0xd3   :  { %229 = vst [vmem:[#allocation7 + $0x18] sm:$0xff] %v218_v23 }
  0xd7   :  { %v204_v24 = vpop.f32.mrf.mxu2 }
  0xd8   :  { %232 = vst [vmem:[#allocation7 + $0x30] sm:$0xff] %v204_v24  ;;  %v223_v25 = vpop.f32.mrf.mxu3 }
  0xd9   :  { %233 = vst [vmem:[#allocation7 + $0x38] sm:$0xff] %v223_v25 }
  0xda   :  { %246 = dma.vmem_to_hbm [thread:$0]  %s239_s1, 1024, %s241_s23, [#allocation4], %s450_s24, %s450_s24, %s451_s25  }
  0xdb   :  { %443 = dma.done.wait [#allocation4], 1024  }
  0xdc   :  { %444 = vsyncadd [#allocation4], 4294966272 }
  0xdd   :  { %251 = vsyncpa [#allocation3], 1 }
  0xde   :  { %252 = vsyncpa [#allocation6], 1 }
  0xdf   :  { %253 = vsyncpa [#allocation4], 1 }

</bundles_post_ra>
